<compile_context>
chip_gen: v7x
topology: tpu7x:2x2x1
jax: 0.10.0
libtpu: 0.0.40
codegen_flags: <defaults>
</compile_context>

<pallas_src>
import math

import numpy as np
import jax
import jax.numpy as jnp
from jax.experimental import pallas as pl
from jax.experimental.pallas import tpu as pltpu

# ----------------------------- configs (small) -----------------------------
BATCH = 2
SEQ_LEN = 16
PRED_LEN = 8
ENC_IN = 4                      # channels (features == 'M')
PERIOD = 4
NUMS = SEQ_LEN // PERIOD        # 4
D_MODEL = 32
MOVING_AVG = 5                  # odd kernel -> output length == seq_len
KERNEL_LIST = (3, 5)
POOLING_SIZE = 2
DROPOUT = 0.0                   # dropout with p=0 / eval mode is the identity
N_ROWS = BATCH * ENC_IN         # 8 rows handled by the kernel
PAD = (MOVING_AVG - 1) // 2
LANES = 128
WIDE = 6 * LANES                # 768-wide fused front-end matmul

# slab row layout (all regions start at multiples of 8 sublanes)
R_BCONV = 0                     # 8 rows  : conv bias tile (replicated sublanes)
R_BLONG = 8                     # 8 rows  : long bias tile (replicated sublanes)
R_G = 16                        # 128 rows: score block-sum-broadcast matrix
R_WS = 144                      # 128 rows: stacked season projection, cols 0:P
R_BOUT = 272                    # 8 rows  : bt + bs, cols 0:P (replicated sublanes)
SLAB_ROWS = 280

# layout assumptions baked into the kernel
assert NUMS * D_MODEL == LANES and PERIOD * D_MODEL == LANES
assert SEQ_LEN == PERIOD * NUMS
assert PERIOD == 4 and POOLING_SIZE == 2   # max-pool pairs (0,1),(2,3) hardcoded
assert MOVING_AVG % 2 == 1
assert N_ROWS % 8 == 0


# ------------------------------- the kernel --------------------------------
def sdhnet_kernel(x_ref, m_ref, slab_ref, out_ref):
    x = x_ref[...]                                            # [8, 16] raw channel-major rows

    # ---- fused front-end: ONE wide matmul covering conv p=0..3, long, trend ----
    feats = jnp.dot(x, m_ref[...], preferred_element_type=jnp.float32)   # [8, 768]
    f0 = feats[:, 0:128]
    f1 = feats[:, 128:256]
    f2 = feats[:, 256:384]
    f3 = feats[:, 384:512]
    f_long = feats[:, 512:640]
    trend128 = feats[:, 640:768]     # trend projection with "+ seq_last" folded; cols P:128 == 0

    bconv = slab_ref[R_BCONV:R_BCONV + 8, :]                  # [8,128] replicated bias tiles
    blong = slab_ref[R_BLONG:R_BLONG + 8, :]

    # ---- ShortExtractor: conv + ReLU + max-pool(2) + mean ----
    # Shared bias per position block + monotone ReLU => pool first, ReLU once per pair.
    m01 = jnp.maximum(f0, f1)
    m23 = jnp.maximum(f2, f3)
    tok_all = 0.5 * (jnp.maximum(m01 + bconv, 0.0) + jnp.maximum(m23 + bconv, 0.0))  # [8,128]

    # ---- LongExtractor: h_t = mean_i relu(.); replicate h_t into every 32-lane block (XLU rolls) ----
    h_all = jnp.maximum(f_long + blong, 0.0)                  # [8,128], columns i*32 + d
    h1 = h_all + pltpu.roll(h_all, shift=64, axis=1)
    # 1/sqrt(d_model) attention scale folded into the mean factor
    h_tile = (0.25 / math.sqrt(D_MODEL)) * (h1 + pltpu.roll(h1, shift=32, axis=1))

    # ---- FeatureUnion: softmax attention of h_t over the NUMS tokens ----
    # G sums tok_j . h_t within each 32-lane block and broadcasts the score across it.
    s_tile = jnp.dot(tok_all * h_tile, slab_ref[R_G:R_G + 128, :],
                     preferred_element_type=jnp.float32)      # [8, 128]
    smax = jnp.max(s_tile, axis=1, keepdims=True)             # max over j (blocks are constant)
    e_tile = jnp.exp(s_tile - smax)
    z32 = jnp.sum(e_tile, axis=1, keepdims=True)              # = 32 * sum_j exp(s_j - smax)
    a_tile = e_tile * (32.0 * pl.reciprocal(z32, approx=True))  # softmax weight a_j per block (EUP)

    # ---- season projection + trend + biases (all lane-dense, cols P:128 stay zero) ----
    # mix @ Ws_stacked == (h_t + sum_j a_j * tok_j) @ ws
    mix = 0.25 * h_all + a_tile * tok_all                     # [8, 128]
    season128 = jnp.dot(mix, slab_ref[R_WS:R_WS + 128, :],
                        preferred_element_type=jnp.float32)   # [8, 128]
    out_ref[...] = trend128 + season128 + slab_ref[R_BOUT:R_BOUT + 8, :]


def _sdhnet_pallas(x_bc, m_wide, slab):
    # No grid: single invocation, full arrays resident in VMEM (<< 1 MiB), no
    # pipeline bookkeeping or double-buffering of the param slab.
    # TODO(synk): for real batch sizes, add a leading row-tile grid axis
    # (multiples of 8 rows) marked "parallel" so v7x's second TensorCore is used.
    return pl.pallas_call(
        sdhnet_kernel,
        out_shape=jax.ShapeDtypeStruct((N_ROWS, LANES), jnp.float32),
    )(x_bc, m_wide, slab)


# ------------------------------ JAX glue ------------------------------------
@jax.jit
def model_forward(batch_x, batch_y, m_wide, slab):
    """batch_x: [B, seq_len, C] (NLC, like the PyTorch module). batch_y unused."""
    del batch_y
    B, L, C = batch_x.shape
    x_bc = jnp.transpose(batch_x, (0, 2, 1)).reshape(B * C, L).astype(jnp.float32)
    out128 = _sdhnet_pallas(x_bc, m_wide, slab)               # [B*C, 128], cols P:128 are zero
    res = out128[:, :PRED_LEN]                                # lane slice done in the wrapper
    return res.reshape(B, C, PRED_LEN).transpose(0, 2, 1)     # [B, pred_len, C]


# --------------------- init-time parameter folding --------------------------
def init_params(key):
    def linear(k, fan_in, fan_out):
        k1, k2 = jax.random.split(k)
        bound = 1.0 / math.sqrt(fan_in)
        w = jax.random.uniform(k1, (fan_in, fan_out), jnp.float32, -bound, bound)
        b = jax.random.uniform(k2, (1, fan_out), jnp.float32, -bound, bound)
        return w, b

    keys = jax.random.split(key, 5)
    wt, bt = linear(keys[0], SEQ_LEN, PRED_LEN)            # trend_project
    wc0, bc0 = linear(keys[1], KERNEL_LIST[0], D_MODEL)    # ShortExtractor conv k=3
    wc1, bc1 = linear(keys[2], KERNEL_LIST[1], D_MODEL)    # ShortExtractor conv k=5
    wl, bl = linear(keys[3], NUMS, D_MODEL)                # LongExtractor
    ws, bs = linear(keys[4], D_MODEL, PRED_LEN)            # season_project
    return (wt, bt, wc0, bc0, wc1, bc1, wl, bl, ws, bs)


def build_params_folded(params):
    """Fold decomposition / sampling / conv / linears / seq_last into
    one wide x-side matrix [16, 768] + one param slab [280, 128] (done once).
    NOTE: on v5e, storing m_wide / G / Ws in bf16 (and casting x to bf16 with f32
    accumulation) halves the param DMA; kept f32 here to track the f32 reference."""
    wt, bt, wc0, bc0, wc1, bc1, wl, bl, ws, bs = [np.asarray(p, np.float32) for p in params]
    L, P, PD, NM, D, m, pad = SEQ_LEN, PRED_LEN, PERIOD, NUMS, D_MODEL, MOVING_AVG, PAD

    # edge-replication pad operator:  x_pad = x @ E,   E [L, L+2*pad]
    E = np.zeros((L, L + 2 * pad), np.float32)
    for c in range(L + 2 * pad):
        E[min(max(c - pad, 0), L - 1), c] = 1.0
    # moving average: trend = x_pad @ MA,   MA [L+2*pad, L]
    MA = np.zeros((L + 2 * pad, L), np.float32)
    for t in range(L):
        MA[t:t + m, t] = 1.0 / m
    T = E @ MA                                   # trend operator  [L, L]
    S = np.eye(L, dtype=np.float32) - T          # season operator [L, L]
    # "subtract last value" operator:  x_centered = x_raw @ Dm
    Dm = np.eye(L, dtype=np.float32)
    Dm[L - 1, :] -= 1.0
    DS, DT = Dm @ S, Dm @ T

    # ShortExtractor conv taps folded (both kernel sizes summed, zero-padded 'same'):
    # Wc[src, p, d] maps within-chunk input position src -> output position p
    Wc = np.zeros((PD, PD, D), np.float32)
    for wk in (wc0, wc1):
        k = wk.shape[0]
        half = k // 2
        for p_ in range(PD):
            for t in range(k):
                src = p_ + t - half
                if 0 <= src < PD:
                    Wc[src, p_, :] += wk[t, :]
    # conv as one matmul over the season row: output column layout p*(NM*D) + j*D + d
    Wconv = np.zeros((L, PD * NM * D), np.float32)
    for j in range(NM):
        for src in range(PD):
            for p_ in range(PD):
                c0 = p_ * NM * D + j * D
                Wconv[j * PD + src, c0:c0 + D] = Wc[src, p_, :]
    # LongExtractor as one matmul: output column layout i*D + d
    Wlong = np.zeros((L, PD * D), np.float32)
    for j in range(NM):
        for i in range(PD):
            Wlong[j * PD + i, i * D:(i + 1) * D] = wl[j, :]

    # wide x-side matrix [L, 768]: conv (512) | long (128) | trend+seq_last (P) | zeros
    m_wide = np.zeros((L, WIDE), np.float32)
    m_wide[:, 0:512] = DS @ Wconv
    m_wide[:, 512:640] = DS @ Wlong
    m_wide[:, 640:640 + P] = DT @ wt
    m_wide[L - 1, 640:640 + P] += 1.0            # fold "+ seq_last" into the trend block

    slab = np.zeros((SLAB_ROWS, LANES), np.float32)
    bconv = (bc0 + bc1).reshape(D)
    slab[R_BCONV:R_BCONV + 8, :] = np.tile(bconv, NM)[None, :]          # shared by all 4 positions
    slab[R_BLONG:R_BLONG + 8, :] = np.tile(bl.reshape(D), PD)[None, :]
    # attention-score block-sum-broadcast matrix (1/sqrt(d_model) folded into h_tile)
    G = np.zeros((NM * D, NM * D), np.float32)
    for j in range(NM):
        G[j * D:(j + 1) * D, j * D:(j + 1) * D] = 1.0
    slab[R_G:R_G + 128, :] = G
    # season projection stacked over the 32-lane blocks: row blk*D + d -> ws[d, :]
    slab[R_WS:R_WS + 128, 0:P] = np.tile(ws, (NM, 1))
    slab[R_BOUT:R_BOUT + 8, 0:P] = (bt + bs).reshape(1, P)
    return jnp.asarray(m_wide), jnp.asarray(slab)


if __name__ == "__main__":
    key = jax.random.PRNGKey(0)
    kx, ky = jax.random.split(key, 2)
    batch_x = jax.random.normal(kx, (BATCH, SEQ_LEN, ENC_IN), jnp.float32)
    batch_y = jax.random.normal(ky, (BATCH, PRED_LEN, ENC_IN), jnp.float32)  # unused by forward
    params = init_params(jax.random.PRNGKey(42))
    m_wide, slab = build_params_folded(params)

    out = model_forward(batch_x, batch_y, m_wide, slab)
    out = jax.block_until_ready(out)
    assert out.shape == (BATCH, PRED_LEN, ENC_IN), out.shape
    assert bool(jnp.all(jnp.isfinite(out)))
    print("KERNEL_OK")
</pallas_src>

<mosaic_0001>
module attributes {stable_mosaic.version = 11 : i64} {
  func.func @sdhnet_kernel(%arg0: memref<8x16xf32, #tpu.memory_space<vmem>>, %arg1: memref<16x768xf32, #tpu.memory_space<vmem>>, %arg2: memref<280x128xf32, #tpu.memory_space<vmem>>, %arg3: memref<8x128xf32, #tpu.memory_space<vmem>>) attributes {dimension_semantics = [], scalar_prefetch = 0 : i64, scratch_operands = 0 : i64, tpu.core_type = #tpu.core_type<tc>} {
    %c0 = arith.constant 0 : index
    %c0_0 = arith.constant 0 : index
    %0 = vector.load %arg0[%c0, %c0_0] : memref<8x16xf32, #tpu.memory_space<vmem>>, vector<8x16xf32>
    %c0_1 = arith.constant 0 : index
    %c0_2 = arith.constant 0 : index
    %1 = vector.load %arg1[%c0_1, %c0_2] : memref<16x768xf32, #tpu.memory_space<vmem>>, vector<16x768xf32>
    %cst = arith.constant dense<0.000000e+00> : vector<8x768xf32>
    %2 = tpu.matmul %0, %1, %cst {dimension_numbers = #tpu.dot_dimension_numbers<[1], [0], [0], [1], [0, 0, 1, 1], [], []>} : vector<8x16xf32>, vector<16x768xf32>, vector<8x768xf32> -> vector<8x768xf32>
    %3 = vector.extract_strided_slice %2 {offsets = [0, 0], sizes = [8, 128], strides = [1, 1]} : vector<8x768xf32> to vector<8x128xf32>
    %4 = vector.extract_strided_slice %2 {offsets = [0, 128], sizes = [8, 128], strides = [1, 1]} : vector<8x768xf32> to vector<8x128xf32>
    %5 = vector.extract_strided_slice %2 {offsets = [0, 256], sizes = [8, 128], strides = [1, 1]} : vector<8x768xf32> to vector<8x128xf32>
    %6 = vector.extract_strided_slice %2 {offsets = [0, 384], sizes = [8, 128], strides = [1, 1]} : vector<8x768xf32> to vector<8x128xf32>
    %7 = vector.extract_strided_slice %2 {offsets = [0, 512], sizes = [8, 128], strides = [1, 1]} : vector<8x768xf32> to vector<8x128xf32>
    %8 = vector.extract_strided_slice %2 {offsets = [0, 640], sizes = [8, 128], strides = [1, 1]} : vector<8x768xf32> to vector<8x128xf32>
    %c0_3 = arith.constant 0 : index
    %c0_4 = arith.constant 0 : index
    %9 = vector.load %arg2[%c0_3, %c0_4] : memref<280x128xf32, #tpu.memory_space<vmem>>, vector<8x128xf32>
    %c8 = arith.constant 8 : index
    %c0_5 = arith.constant 0 : index
    %10 = vector.load %arg2[%c8, %c0_5] : memref<280x128xf32, #tpu.memory_space<vmem>>, vector<8x128xf32>
    %11 = arith.maximumf %3, %4 : vector<8x128xf32>
    %12 = arith.maximumf %5, %6 : vector<8x128xf32>
    %13 = arith.addf %11, %9 : vector<8x128xf32>
    %cst_6 = arith.constant 0.000000e+00 : f32
    %14 = vector.broadcast %cst_6 : f32 to vector<8x128xf32>
    %15 = arith.maximumf %13, %14 : vector<8x128xf32>
    %16 = arith.addf %12, %9 : vector<8x128xf32>
    %cst_7 = arith.constant 0.000000e+00 : f32
    %17 = vector.broadcast %cst_7 : f32 to vector<8x128xf32>
    %18 = arith.maximumf %16, %17 : vector<8x128xf32>
    %19 = arith.addf %15, %18 : vector<8x128xf32>
    %cst_8 = arith.constant 5.000000e-01 : f32
    %20 = vector.broadcast %cst_8 : f32 to vector<8x128xf32>
    %21 = arith.mulf %20, %19 : vector<8x128xf32>
    %22 = arith.addf %7, %10 : vector<8x128xf32>
    %cst_9 = arith.constant 0.000000e+00 : f32
    %23 = vector.broadcast %cst_9 : f32 to vector<8x128xf32>
    %24 = arith.maximumf %22, %23 : vector<8x128xf32>
    %c64_i32 = arith.constant 64 : i32
    %25 = tpu.dynamic_rotate %24 by %c64_i32 dim 1 : vector<8x128xf32>, i32 -> vector<8x128xf32>
    %26 = arith.addf %24, %25 : vector<8x128xf32>
    %c32_i32 = arith.constant 32 : i32
    %27 = tpu.dynamic_rotate %26 by %c32_i32 dim 1 : vector<8x128xf32>, i32 -> vector<8x128xf32>
    %28 = arith.addf %26, %27 : vector<8x128xf32>
    %cst_10 = arith.constant 0.0441941731 : f32
    %29 = vector.broadcast %cst_10 : f32 to vector<8x128xf32>
    %30 = arith.mulf %29, %28 : vector<8x128xf32>
    %31 = arith.mulf %21, %30 : vector<8x128xf32>
    %c16 = arith.constant 16 : index
    %c0_11 = arith.constant 0 : index
    %32 = vector.load %arg2[%c16, %c0_11] : memref<280x128xf32, #tpu.memory_space<vmem>>, vector<128x128xf32>
    %cst_12 = arith.constant dense<0.000000e+00> : vector<8x128xf32>
    %33 = tpu.matmul %31, %32, %cst_12 {dimension_numbers = #tpu.dot_dimension_numbers<[1], [0], [0], [1], [0, 0, 1, 1], [], []>} : vector<8x128xf32>, vector<128x128xf32>, vector<8x128xf32> -> vector<8x128xf32>
    %cst_13 = arith.constant dense<0xFF800000> : vector<8xf32>
    %34 = vector.multi_reduction <maximumf>, %33, %cst_13 [1] : vector<8x128xf32> to vector<8xf32>
    %35 = vector.shape_cast %34 : vector<8xf32> to vector<8x1xf32>
    %36 = vector.broadcast %35 : vector<8x1xf32> to vector<8x128xf32>
    %37 = arith.subf %33, %36 : vector<8x128xf32>
    %38 = math.exp %37 : vector<8x128xf32>
    %cst_14 = arith.constant dense<0.000000e+00> : vector<8xf32>
    %39 = vector.multi_reduction <add>, %38, %cst_14 [1] : vector<8x128xf32> to vector<8xf32>
    %40 = vector.shape_cast %39 : vector<8xf32> to vector<8x1xf32>
    %41 = tpu.reciprocal %40 {approx = true} : vector<8x1xf32> -> vector<8x1xf32>
    %cst_15 = arith.constant 3.200000e+01 : f32
    %42 = vector.broadcast %cst_15 : f32 to vector<8x1xf32>
    %43 = arith.mulf %42, %41 : vector<8x1xf32>
    %44 = vector.broadcast %43 : vector<8x1xf32> to vector<8x128xf32>
    %45 = arith.mulf %38, %44 : vector<8x128xf32>
    %cst_16 = arith.constant 2.500000e-01 : f32
    %46 = vector.broadcast %cst_16 : f32 to vector<8x128xf32>
    %47 = arith.mulf %46, %24 : vector<8x128xf32>
    %48 = arith.mulf %45, %21 : vector<8x128xf32>
    %49 = arith.addf %47, %48 : vector<8x128xf32>
    %c144 = arith.constant 144 : index
    %c0_17 = arith.constant 0 : index
    %50 = vector.load %arg2[%c144, %c0_17] : memref<280x128xf32, #tpu.memory_space<vmem>>, vector<128x128xf32>
    %cst_18 = arith.constant dense<0.000000e+00> : vector<8x128xf32>
    %51 = tpu.matmul %49, %50, %cst_18 {dimension_numbers = #tpu.dot_dimension_numbers<[1], [0], [0], [1], [0, 0, 1, 1], [], []>} : vector<8x128xf32>, vector<128x128xf32>, vector<8x128xf32> -> vector<8x128xf32>
    %52 = arith.addf %8, %51 : vector<8x128xf32>
    %c272 = arith.constant 272 : index
    %c0_19 = arith.constant 0 : index
    %53 = vector.load %arg2[%c272, %c0_19] : memref<280x128xf32, #tpu.memory_space<vmem>>, vector<8x128xf32>
    %54 = arith.addf %52, %53 : vector<8x128xf32>
    %c0_20 = arith.constant 0 : index
    %c0_21 = arith.constant 0 : index
    %55 = vector.load %arg3[%c0_20, %c0_21] : memref<8x128xf32, #tpu.memory_space<vmem>>, vector<8x128xf32>
    tpu.vector_store %arg3[%c0_20, %c0_21], %54 {strides = array<i32>} : memref<8x128xf32, #tpu.memory_space<vmem>>, vector<8x128xf32>,
    return
  }
}

</mosaic_0001>

<bundles_post_ra>
// kernel: model_forward.1
= control target key start
LH: loop header
LB: loop body
LE: loop exit
PB: predicated region body
PF: predicated region fallthrough
CT: control target
= control target key end

     0   :  { %8 = vsyncpa [#allocation3], 0  ;;  %s897_s0 = inlined_call_operand.hbm [shape: f32[8,16], index: 0, kind: input, shape index: {}]   ;;  %s898_s1 = inlined_call_operand.hbm [shape: f32[16,768], index: 1, kind: input, shape index: {}]   ;;  %s899_s2 = inlined_call_operand.hbm [shape: f32[280,128], index: 2, kind: input, shape index: {}]   ;;  %s900_s3 = inlined_call_operand.hbm [shape: f32[8,128], index: 3, kind: output, shape index: {}]  }
   0x1   :  { %9 = vsyncpa [#allocation6], 0 }
   0x2   :  { %10 = vsyncpa [#allocation4], 0  ;;  %s787_s12 = smov [#allocation5]   ;;  %s693_s16 = scalar_lea.hbm %s898_s1, 1536 }
   0x3   :  { %s26_s13 = sshll.u32 %s787_s12, 4  ;;  %p694_p0 = scmp.ne.s32.totalorder %s898_s1, %s693_s16  ;;  %s27_s13 = int_to_ptr.vmem [resolvable:$true] %s26_s13 }
   0x4   :  { %p697_p1 = scmp.lt.u32.totalorder %s693_s16, %s898_s1 }
   0x6   :  { %p699_p2 = pnand %p697_p1, %p694_p0 }
   0x8   :  { %702 = shalt.err (!%p699_p2)
}
   0x9   :  { %s703_s21 = scalar_lea.vmem %s27_s13, 1536  ;;  %p708_p4 = scmp.lt.s32.totalorder %s27_s13, %s27_s13 }
   0xa   :  { %p704_p3 = scmp.ne.s32.totalorder %s27_s13, %s703_s21  ;;  %p709_p5 = scmp.lt.s32.totalorder %s703_s21, %s703_s21 }
   0xc   :  { %p710_p6 = por %p709_p5, %p708_p4 }
   0xe   :  { %p711_p7 = pnand %p710_p6, %p704_p3 }
  0x10   :  { %714 = shalt.err (!%p711_p7)
}
  0x11   :  { %s788_s22 = smov 768   ;;  %s789_s23 = smov 48  }
  0x12   :  { %32 = dma.hbm_to_vmem [thread:$0]  %s898_s1, 1536, %s27_s13, [#allocation6], %s788_s22, %s788_s22, %s789_s23  }
  0x13   :  { %s790_s26 = smov [#allocation2]   ;;  %s791_s28 = smov [#allocation7]  }
  0x14   :  { %s17_s27 = sshll.u32 %s790_s26, 4  ;;  %s38_s29 = sshll.u32 %s791_s28, 4  ;;  %s18_s27 = int_to_ptr.vmem [resolvable:$true] %s17_s27  ;;  %s39_s29 = int_to_ptr.vmem [resolvable:$true] %s38_s29 }
  0x15   :  { %s715_s5 = scalar_lea.hbm %s897_s0, 128 }
  0x16   :  { %p716_p8 = scmp.ne.s32.totalorder %s897_s0, %s715_s5  ;;  %p719_p9 = scmp.lt.u32.totalorder %s715_s5, %s897_s0 }
  0x18   :  { %p721_p10 = pnand %p719_p9, %p716_p8 }
  0x1a   :  { %724 = shalt.err (!%p721_p10)
}
  0x1b   :  { %s725_s1 = scalar_lea.vmem %s18_s27, 128  ;;  %p730_p12 = scmp.lt.s32.totalorder %s18_s27, %s18_s27 }
  0x1c   :  { %p726_p11 = scmp.ne.s32.totalorder %s18_s27, %s725_s1  ;;  %p731_p13 = scmp.lt.s32.totalorder %s725_s1, %s725_s1 }
  0x1e   :  { %p732_p0 = por %p731_p13, %p730_p12 }
  0x20   :  { %p733_p1 = pnand %p732_p0, %p726_p11 }
  0x22   :  { %736 = shalt.err (!%p733_p1)
}
  0x23   :  { %20 = dma.hbm_to_vmem [thread:$0]  %s897_s0, 128, %s18_s27, [#allocation3]  }
  0x24   :  { %s737_s14 = scalar_lea.hbm %s899_s2, 4480 }
  0x25   :  { %p738_p2 = scmp.ne.s32.totalorder %s899_s2, %s737_s14  ;;  %p741_p3 = scmp.lt.u32.totalorder %s737_s14, %s899_s2 }
  0x27   :  { %p743_p4 = pnand %p741_p3, %p738_p2 }
  0x29   :  { %746 = shalt.err (!%p743_p4)
}
  0x2a   :  { %s747_s19 = scalar_lea.vmem %s39_s29, 4480  ;;  %p752_p6 = scmp.lt.s32.totalorder %s39_s29, %s39_s29 }
  0x2b   :  { %p748_p5 = scmp.ne.s32.totalorder %s39_s29, %s747_s19  ;;  %p753_p7 = scmp.lt.s32.totalorder %s747_s19, %s747_s19 }
  0x2d   :  { %p754_p8 = por %p753_p7, %p752_p6 }
  0x2f   :  { %p755_p9 = pnand %p754_p8, %p748_p5 }
  0x31   :  { %758 = shalt.err (!%p755_p9)
}
  0x32   :  { %s792_s0 = smov 128   ;;  %s793_s20 = smov 8  }
  0x33   :  { %44 = dma.hbm_to_vmem [thread:$0]  %s899_s2, 4480, %s39_s29, [#allocation6], %s792_s0, %s792_s0, %s793_s20  }
  0x34   :  { %781 = dma.done.wait [#allocation3], 128  }
  0x35   :  { %782 = vsyncadd [#allocation3], 4294967168 }
  0x36   :  { %783 = dma.done.wait [#allocation6], 6016  }
  0x37   :  { %784 = vsyncadd [#allocation6], 4294961280  ;;  %v794_v0 = vmov 0.0   ;;  %v56_v1 = vld [vmem:[#allocation5 + $0x8] sm:$0xff]  ;;  %v62_v2 = vld [vmem:[#allocation5 + $0x38] sm:$0xff]  ;;  %vm67_vm0 = vcmask 130048  }
  0x38   :  { %135 = vmatprep.mubr.f32.mxu0 %v794_v0  ;;  %206 = vmatprep.mubr.f32.mxu1 %v794_v0  ;;  %v58_v3 = vld [vmem:[#allocation5 + $0x18] sm:$0xff]  ;;  %v616_v4 = vpack.c.bf16 %v62_v2, %v56_v1  ;;  %v64_v5 = vld [vmem:[#allocation5 + $0x48] sm:$0xff]  ;;  %v55_v6 = vld [vmem:[#allocation5] sm:$0xff]  ;;  %v795_v23 = vmov 0.0|0.0   ;;  %s796_s2 = smov 64   ;;  %vm797_vm1 = vmmov 0  }
  0x39   :  { %v61_v7 = vld [vmem:[#allocation5 + $0x30] sm:$0xff]  ;;  %v620_v8 = vpack.c.bf16 %v64_v5, %v58_v3  ;;  %v63_v11 = vld [vmem:[#allocation5 + $0x40] sm:$0xff]  ;;  %v60_v13 = vld [vmem:[#allocation5 + $0x28] sm:$0xff]  ;;  %s798_s23 = smov 32   ;;  %s799_s24 = smov [#allocation8]  }
  0x3a   :  { %v618_v9 = vpack.c.bf16 %v61_v7, %v55_v6  ;;  %v57_v10 = vld [vmem:[#allocation5 + $0x10] sm:$0xff]  ;;  %617 = vmatprep.subr.bf16.mxu0 %v616_v4  ;;  %v66_v14 = vld [vmem:[#allocation5 + $0x58] sm:$0xff]  ;;  %v59_v15 = vld [vmem:[#allocation5 + $0x20] sm:$0xff]  ;;  %s499_s25 = sshll.u32 %s799_s24, 4  ;;  %s500_s25 = int_to_ptr.vmem [resolvable:$true] %s499_s25 }
  0x3b   :  { %v622_v12 = vpack.c.bf16 %v63_v11, %v57_v10  ;;  %621 = vmatprep.subr.bf16.mxu1 %v620_v8  ;;  %v54_v16 = vld [vmem:[#allocation2] sm:$0xff]  ;;  %v624_v17 = vpack.c.bf16 %v66_v14, %v60_v13  ;;  %v65_v18 = vld [vmem:[#allocation5 + $0x50] sm:$0xff]  ;;  %v306_v22 = vld [vmem:[#allocation7 + $0x20] sm:$0xff]  ;;  %s759_s26 = scalar_lea.vmem %s500_s25, 128  ;;  %p764_p11 = scmp.lt.s32.totalorder %s500_s25, %s500_s25 }
  0x3c   :  { %619 = vmatpush1.bf16.msra.mxu0 %v618_v9  ;;  %v626_v19 = vpack.c.bf16 %v65_v18, %v59_v15  ;;  %v304_v20 = vld [vmem:[#allocation7 + $0x10] sm:$0xff]  ;;  %v305_v21 = vld [vmem:[#allocation7 + $0x18] sm:$0xff]  ;;  %v307_v25 = vld [vmem:[#allocation7 + $0x28] sm:$0xff]  ;;  %p760_p10 = scmp.ne.s32.totalorder %s500_s25, %s759_s26  ;;  %p765_p12 = scmp.lt.s32.totalorder %s759_s26, %s759_s26 }
  0x3d   :  { %623 = vmatpush1.bf16.msra.mxu1 %v622_v12  ;;  %625 = vmatprep.subr.bf16.mxu0 %v624_v17  ;;  %v629_v24 = vpack.c.bf16 %v305_v21, %v304_v20  ;;  %v284_v29 = vld [vmem:[#allocation7] sm:$0xff]  ;;  %v632_v30 = vpack.c.bf16 %v307_v25, %v306_v22  ;;  %v285_v33 = vld [vmem:[#allocation7 + $0x8] sm:$0xff]  ;;  %v308_v34 = vld [vmem:[#allocation7 + $0x30] sm:$0xff] }
  0x3e   :  { %628 = vmatprep.subr.bf16.mxu1 %v795_v23  ;;  %v309_v35 = vld [vmem:[#allocation7 + $0x38] sm:$0xff]  ;;  %v310_v44 = vld [vmem:[#allocation7 + $0x40] sm:$0xff]  ;;  %v311_v45 = vld [vmem:[#allocation7 + $0x48] sm:$0xff]  ;;  %p766_p13 = por %p765_p12, %p764_p11 }
  0x3f   :  { %509 = vmatmul.mubr.msk.f32.vlgmr.msra.gmra.mrb[0].mxu0 %vm67_vm0, %v54_v16  ;;  %v635_v42 = vpack.c.bf16 %v309_v35, %v308_v34  ;;  %v638_v49 = vpack.c.bf16 %v311_v45, %v310_v44  ;;  %v312_v50 = vld [vmem:[#allocation7 + $0x50] sm:$0xff]  ;;  %v313_v51 = vld [vmem:[#allocation7 + $0x58] sm:$0xff]  ;;  %v314_v53 = vld [vmem:[#allocation7 + $0x60] sm:$0xff] }
  0x40   :  { %510 = vmatmul.mubr.msk.f32.vlgmr.msra.gmra.mrb[0].mxu1 %vm67_vm0, %v54_v16  ;;  %627 = vmatpush1.bf16.msra.mxu0 %v626_v19  ;;  %v641_v52 = vpack.c.bf16 %v313_v51, %v312_v50  ;;  %v315_v54 = vld [vmem:[#allocation7 + $0x68] sm:$0xff]  ;;  %v316_v56 = vld [vmem:[#allocation7 + $0x70] sm:$0xff]  ;;  %v317_v57 = vld [vmem:[#allocation7 + $0x78] sm:$0xff]  ;;  %p767_p0 = pnand %p766_p13, %p760_p10 }
  0x41   :  { %277 = vmatprep.mubr.f32.mxu0 %v794_v0  ;;  %652 = vmatprep.subr.bf16.mxu0 %v795_v23  ;;  %v644_v55 = vpack.c.bf16 %v315_v54, %v314_v53  ;;  %v647_v58 = vpack.c.bf16 %v317_v57, %v316_v56  ;;  %v318_v59 = vld [vmem:[#allocation7 + $0x80] sm:$0xff]  ;;  %v319_v60 = vld [vmem:[#allocation7 + $0x88] sm:$0xff]  ;;  %v403_v8 = vld [vmem:[#allocation7 + $0x90] sm:$0xff] }
  0x42   :  { %630 = vmatpush3.bf16.msra.mxu1 %v629_v24  ;;  %v650_v61 = vpack.c.bf16 %v319_v60, %v318_v59  ;;  %578 = vmatprep.mubr.msk.f32.mxu1 %vm797_vm1, %v794_v0  ;;  %v404_v9 = vld [vmem:[#allocation7 + $0x98] sm:$0xff]  ;;  %v405_v10 = vld [vmem:[#allocation7 + $0xa0] sm:$0xff]  ;;  %v406_v12 = vld [vmem:[#allocation7 + $0xa8] sm:$0xff] }
  0x43   :  { %511 = vmatmul.mubr.msk.f32.vlgmr.msra.gmra.mrb[2].mxu0 %vm67_vm0, %v54_v16  ;;  %631 = vmatprep.subr.bf16.mxu1 %v795_v23  ;;  %v653_v11 = vpack.c.bf16 %v404_v9, %v403_v8  ;;  %v407_v13 = vld [vmem:[#allocation7 + $0xb0] sm:$0xff]  ;;  %v408_v14 = vld [vmem:[#allocation7 + $0xb8] sm:$0xff]  ;;  %v409_v20 = vld [vmem:[#allocation7 + $0xc0] sm:$0xff] }
  0x44   :  { %613 = vmatprep.mubr.msk.f32.mxu0 %vm797_vm1, %v794_v0  ;;  %v656_v0 = vpack.c.bf16 %v406_v12, %v405_v10  ;;  %v659_v15 = vpack.c.bf16 %v408_v14, %v407_v13  ;;  %v410_v21 = vld [vmem:[#allocation7 + $0xc8] sm:$0xff]  ;;  %v411_v24 = vld [vmem:[#allocation7 + $0xd0] sm:$0xff]  ;;  %v412_v25 = vld [vmem:[#allocation7 + $0xd8] sm:$0xff] }
  0x45   :  { %654 = vmatpush3.bf16.msra.mxu0 %v653_v11  ;;  %v662_v22 = vpack.c.bf16 %v410_v21, %v409_v20  ;;  %v418_v34 = vld [vmem:[#allocation7 + $0x108] sm:$0xff]  ;;  %v490_v45 = vld [vmem:[#allocation7 + $0x110] sm:$0xff] }
  0x46   :  { %633 = vmatpush3.bf16.msra.mxu1 %v632_v30  ;;  %655 = vmatprep.subr.bf16.mxu0 %v795_v23  ;;  %v415_v30 = vld [vmem:[#allocation7 + $0xf0] sm:$0xff] }
  0x47   :  { %634 = vmatprep.subr.bf16.mxu1 %v795_v23 }
  0x49   :  { %657 = vmatpush3.bf16.msra.mxu0 %v656_v0 }
  0x4a   :  { %636 = vmatpush3.bf16.msra.mxu1 %v635_v42  ;;  %658 = vmatprep.subr.bf16.mxu0 %v795_v23 }
  0x4b   :  { %637 = vmatprep.subr.bf16.mxu1 %v795_v23 }
  0x4d   :  { %660 = vmatpush3.bf16.msra.mxu0 %v659_v15 }
  0x4e   :  { %639 = vmatpush3.bf16.msra.mxu1 %v638_v49  ;;  %661 = vmatprep.subr.bf16.mxu0 %v795_v23 }
  0x4f   :  { %640 = vmatprep.subr.bf16.mxu1 %v795_v23 }
  0x51   :  { %663 = vmatpush3.bf16.msra.mxu0 %v662_v22 }
  0x52   :  { %642 = vmatpush3.bf16.msra.mxu1 %v641_v52  ;;  %664 = vmatprep.subr.bf16.mxu0 %v795_v23 }
  0x53   :  { %643 = vmatprep.subr.bf16.mxu1 %v795_v23 }
  0x56   :  { %645 = vmatpush3.bf16.msra.mxu1 %v644_v55 }
  0x57   :  { %646 = vmatprep.subr.bf16.mxu1 %v795_v23 }
  0x5a   :  { %648 = vmatpush3.bf16.msra.mxu1 %v647_v58 }
  0x5b   :  { %649 = vmatprep.subr.bf16.mxu1 %v795_v23 }
  0x5e   :  { %651 = vmatpush3.bf16.msra.mxu1 %v650_v61 }
 0x112   :  { %v137_v26 = vpop.f32.mrb[0].mxu0 }
 0x113   :  { %v208_v27 = vpop.f32.mrb[0].mxu1  ;;  %v139_v28 = vpop.f32.mrb[1].mxu0 }
 0x114   :  { %v286_v31 = vmax.f32 %v137_v26, %v139_v28  ;;  %v210_v32 = vpop.f32.mrb[1].mxu1  ;;  %v665_v26 = vpack.c.bf16 %v412_v25, %v411_v24  ;;  %v414_v28 = vld [vmem:[#allocation7 + $0xe8] sm:$0xff] }
 0x115   :  { %v287_v36 = vmax.f32 %v208_v27, %v210_v32  ;;  %v413_v27 = vld [vmem:[#allocation7 + $0xe0] sm:$0xff] }
 0x116   :  { %v288_v37 = vadd.f32 %v286_v31, %v284_v29  ;;  %v279_v38 = vpop.f32.mrb[2].mxu0  ;;  %666 = vmatpush3.bf16.msra.mxu0 %v665_v26  ;;  %v416_v31 = vld [vmem:[#allocation7 + $0xf8] sm:$0xff] }
 0x117   :  { %v290_v39 = vadd.f32 %v287_v36, %v284_v29  ;;  %v294_v40 = vadd.f32 %v285_v33, %v279_v38  ;;  %v862_v41 = vpop.f32.mrb[3].mxu0  ;;  %667 = vmatprep.subr.bf16.mxu0 %v795_v23  ;;  %v668_v29 = vpack.c.bf16 %v414_v28, %v413_v27  ;;  %v671_v32 = vpack.c.bf16 %v416_v31, %v415_v30  ;;  %v417_v33 = vld [vmem:[#allocation7 + $0x100] sm:$0xff] }
 0x118   :  { %v289_v43 = vmax.f32 %v288_v37, 0.0  ;;  %v674_v35 = vpack.c.bf16 %v418_v34, %v417_v33 }
 0x119   :  { %v291_v46 = vmax.f32 %v290_v39, 0.0  ;;  %v865_v47 = vmax.f32 %v294_v40, 0.0 }
 0x11a   :  { %669 = vmatpush3.bf16.msra.mxu0 %v668_v29 }
 0x11b   :  { %v292_v48 = vadd.f32 %v291_v46, %v289_v43  ;;  %296 = vrot.lane.b32.xlu0 %v865_v47, %s796_s2  ;;  %670 = vmatprep.subr.bf16.mxu0 %v795_v23  ;;  %v400_v40 = vmul.f32 0.25, %v865_v47 }
 0x11d   :  { %v293_v3 = vmul.f32 0.5, %v292_v48 }
 0x11e   :  { %672 = vmatpush3.bf16.msra.mxu0 %v671_v32 }
 0x11f   :  { %673 = vmatprep.subr.bf16.mxu0 %v795_v23 }
 0x122   :  { %675 = vmatpush3.bf16.msra.mxu0 %v674_v35 }
 0x18d   :  { %v297_v62 = vpop.permute.xlu0 %296 }
 0x18e   :  { %v298_v63 = vadd.f32 %v297_v62, %v865_v47 }
 0x190   :  { %299 = vrot.lane.b32.xlu0 %v298_v63, %s798_s23 }
 0x202   :  { %v300_v1 = vpop.permute.xlu0 %299 }
 0x203   :  { %v301_v2 = vadd.f32 %v300_v1, %v298_v63 }
 0x205   :  { %v302_v4 = vmul.f32 0.044194173, %v301_v2 }
 0x207   :  { %v303_v5 = vmul.f32 %v302_v4, %v293_v3 }
 0x209   :  { %579 = vmatmul.mubr.f32.vlgmr.msra.gmra.mrb[2].mxu1 %v303_v5 }
 0x2dc   :  { %v386_v6 = vpop.f32.mrb[2].mxu1 }
 0x2dd   :  { %390 = vmax.xlane.f32.xlu1 %v386_v6  ;;  %v580_v7 = vpop.f32.mrb[3].mxu1 }
 0x36a   :  { %v391_v16 = vpop.xlane.xlu1 %390 }
 0x36b   :  { %v392_v17 = vsub.f32 %v386_v6, %v391_v16 }
 0x36d   :  { %v393_v18 = vmul.f32 1.442695, %v392_v17 }
 0x36f   :  { %689 = vpow2.f32 %v393_v18 }
 0x379   :  { %v690_v19 = vpop.eup %689 }
 0x37a   :  { %395 = vadd.xlane.f32.xlu1 %v690_v19 }
 0x407   :  { %v396_v36 = vpop.xlane.xlu1 %395 }
 0x408   :  { %691 = vrcp.f32 %v396_v36 }
 0x412   :  { %v692_v37 = vpop.eup %691 }
 0x413   :  { %v398_v38 = vmul.f32 32.0, %v692_v37 }
 0x415   :  { %v399_v39 = vmul.f32 %v690_v19, %v398_v38 }
 0x417   :  { %v401_v42 = vmul.f32 %v399_v39, %v293_v3 }
 0x419   :  { %v402_v43 = vadd.f32 %v401_v42, %v400_v40 }
 0x41b   :  { %614 = vmatmul.mubr.f32.vlgmr.msra.gmra.mrb[4].mxu0 %v402_v43 }
 0x4ee   :  { %v485_v44 = vpop.f32.mrb[4].mxu0 }
 0x4ef   :  { %v489_v23 = vadd.f32 %v485_v44, %v862_v41  ;;  %v615_v46 = vpop.f32.mrb[5].mxu0 }
 0x4f1   :  { %v491_v48 = vadd.f32 %v490_v45, %v489_v23 }
 0x4f3   :  { %492 = vst [vmem:[#allocation8] sm:$0xff] %v491_v48 }
 0x4f4   :  { %770 = shalt.err (!%p767_p0)
}
 0x4f5   :  { %s771_s29 = scalar_lea.hbm %s900_s3, 128 }
 0x4f6   :  { %p772_p1 = scmp.ne.s32.totalorder %s900_s3, %s771_s29  ;;  %p775_p2 = scmp.lt.u32.totalorder %s771_s29, %s900_s3 }
 0x4f8   :  { %p777_p3 = pnand %p775_p2, %p772_p1 }
 0x4fa   :  { %780 = shalt.err (!%p777_p3)
}
 0x4fb   :  { %502 = dma.vmem_to_hbm [thread:$0]  %s500_s25, 128, %s900_s3, [#allocation4]  }
 0x4fc   :  { %785 = dma.done.wait [#allocation4], 128  }
 0x4fd   :  { %786 = vsyncadd [#allocation4], 4294967168 }
 0x4fe   :  { %506 = vsyncpa [#allocation3], 1 }
 0x4ff   :  { %507 = vsyncpa [#allocation6], 1 }
 0x500   :  { %508 = vsyncpa [#allocation4], 1 }

</bundles_post_ra>
